<compile_context>
chip_gen: v7x
topology: tpu7x:2x2x1
jax: 0.10.0
libtpu: 0.0.40
codegen_flags: <defaults>
</compile_context>

<pallas_src>
import jax
import jax.numpy as jnp
from jax.experimental import pallas as pl
from jax.experimental.pallas import tpu as pltpu

_TILE_N_MAX = 1024   # batch-tile cap: ~8 MiB VMEM -> safe on v5e/v6e/v7x defaults
_PAD = 128           # lane-dense width for the narrow tail layers / output


def _round_up(n, m):
    return ((n + m - 1) // m) * m


def _pick_tile(n):
    """Batch tile: full batch for tiny N (single block == full array dim),
    otherwise >= 2 grid steps (v7x megacore), multiples of 16 (bf16 sublane
    packing), capped at _TILE_N_MAX."""
    if n <= 16:
        return n
    half = pl.cdiv(n, 2)
    return min(_TILE_N_MAX, _round_up(half, 16))


def _mlp_kernel(x_ref,
                w1_ref, b1_ref, w2_ref, b2_ref, w3_ref, b3_ref,
                w4_ref, b4_ref, w5_ref, b5_ref, wo_ref, bo_ref,
                o_ref):
    bf16 = jnp.bfloat16
    f32 = jnp.float32

    def layer(h, w_ref, b_ref):
        y = jnp.dot(h, w_ref[...], preferred_element_type=f32)
        # bias add + ReLU in f32 (v5e VPU has no bf16 ALUs); carry bf16 between layers
        return jnp.maximum(y + b_ref[...], 0.0).astype(bf16)

    h = x_ref[...].astype(bf16)           # in-kernel f32->bf16 cast, hidden under MXU
    h = layer(h, w1_ref, b1_ref)          # (T, 256)
    h = layer(h, w2_ref, b2_ref)          # (T, 128)
    h = layer(h, w3_ref, b3_ref)          # (T, 128)  cols 64.. are zero
    h = layer(h, w4_ref, b4_ref)          # (T, 128)  cols 32.. are zero
    h = layer(h, w5_ref, b5_ref)          # (T, 128)  cols 16.. are zero
    out = jnp.dot(h, wo_ref[...], preferred_element_type=f32) + bo_ref[...]
    o_ref[...] = out.astype(o_ref.dtype)  # (T, 128) bf16, cols 3.. are zero


@jax.jit
def mlp_forward(x, ebd, params):
    (w1, b1, w2, b2, w3, b3, w4, b4, w5, b5,
     wd1, bd1, wd2, bd2, wd3, bd3, wd4, bd4, wd5, bd5,
     wo, bo) = params

    n = x.shape[0]
    x2d = x.reshape(n, -1).astype(jnp.float32)   # torch.flatten(1); no copy if f32
    e = ebd.astype(jnp.float32)                  # (1, 512)

    # --- fold all ebd-dependent terms into effective biases (tiny, one-time) ---
    d1 = e @ wd1 + bd1
    d2 = e @ wd2 + bd2
    d3 = e @ wd3 + bd3
    d4 = e @ wd4 + bd4
    d5 = e @ wd5 + bd5
    b1_eff = b1 + e @ w1[512:]
    b2_eff = b2 + d1 @ w2[256:]
    b3_eff = b3 + d2 @ w3[128:]
    b4_eff = b4 + d3 @ w4[64:]
    b5_eff = b5 + d4 @ w5[32:]
    bo_eff = bo + d5 @ wo[16:]

    bf16 = jnp.bfloat16

    def pad_w(w, rows, cols):
        return jnp.zeros((rows, cols), bf16).at[:w.shape[0], :w.shape[1]].set(
            w.astype(bf16))

    def pad_b(b, cols):
        return jnp.zeros((1, cols), jnp.float32).at[:, :b.shape[1]].set(b)

    # --- activation halves of the weights (bf16); tail layers padded to 128 ---
    w1a = w1[:512].astype(bf16)          # (512, 256)
    w2a = w2[:256].astype(bf16)          # (256, 128)
    w3a = pad_w(w3[:128], 128, _PAD)     # (128, 64)  -> (128, 128)
    w4a = pad_w(w4[:64], _PAD, _PAD)     # (64, 32)   -> (128, 128)
    w5a = pad_w(w5[:32], _PAD, _PAD)     # (32, 16)   -> (128, 128)
    woa = pad_w(wo[:16], _PAD, _PAD)     # (16, 3)    -> (128, 128)
    b3p = pad_b(b3_eff, _PAD)
    b4p = pad_b(b4_eff, _PAD)
    b5p = pad_b(b5_eff, _PAD)
    bop = pad_b(bo_eff, _PAD)

    # --- batch tiling: ragged last block, no wrapper-side padding of x --------
    tile_n = _pick_tile(n)
    grid = (pl.cdiv(n, tile_n),)

    def const(shape):
        return pl.BlockSpec(shape, lambda i: (0, 0))   # resident in VMEM

    in_specs = [
        pl.BlockSpec((tile_n, 512), lambda i: (i, 0)),   # x tile, pipelined, f32
        const((512, 256)), const((1, 256)),
        const((256, 128)), const((1, 128)),
        const((128, _PAD)), const((1, _PAD)),
        const((_PAD, _PAD)), const((1, _PAD)),
        const((_PAD, _PAD)), const((1, _PAD)),
        const((_PAD, _PAD)), const((1, _PAD)),
    ]

    out_padded = pl.pallas_call(
        _mlp_kernel,
        out_shape=jax.ShapeDtypeStruct((n, _PAD), jnp.bfloat16),
        grid=grid,
        in_specs=in_specs,
        out_specs=pl.BlockSpec((tile_n, _PAD), lambda i: (i, 0)),
        compiler_params=pltpu.CompilerParams(
            dimension_semantics=("parallel",)),
    )(x2d, w1a, b1_eff, w2a, b2_eff, w3a, b3p,
      w4a, b4p, w5a, b5p, woa, bop)

    return out_padded[:, :3].astype(jnp.float32)


def init_params(key):
    """PyTorch-Linear-style uniform(-1/sqrt(in), 1/sqrt(in)) init.
    Weights stored as (in_features, out_features); bias as (1, out_features)."""
    def linear(k, fan_in, fan_out):
        kw, kb = jax.random.split(k)
        bound = 1.0 / (fan_in ** 0.5)
        w = jax.random.uniform(kw, (fan_in, fan_out), jnp.float32, -bound, bound)
        b = jax.random.uniform(kb, (1, fan_out), jnp.float32, -bound, bound)
        return w, b

    keys = jax.random.split(key, 11)
    w1, b1 = linear(keys[0], 1024, 256)   # layer1
    w2, b2 = linear(keys[1], 512, 128)    # layer2
    w3, b3 = linear(keys[2], 256, 64)     # layer3
    w4, b4 = linear(keys[3], 128, 32)     # layer4
    w5, b5 = linear(keys[4], 64, 16)      # layer5
    wd1, bd1 = linear(keys[5], 512, 256)  # down1
    wd2, bd2 = linear(keys[6], 512, 128)  # down2
    wd3, bd3 = linear(keys[7], 512, 64)   # down3
    wd4, bd4 = linear(keys[8], 512, 32)   # down4
    wd5, bd5 = linear(keys[9], 512, 16)   # down5
    wo, bo = linear(keys[10], 32, 3)      # out
    return (w1, b1, w2, b2, w3, b3, w4, b4, w5, b5,
            wd1, bd1, wd2, bd2, wd3, bd3, wd4, bd4, wd5, bd5,
            wo, bo)


def mlp_reference(x, ebd, params):
    """Pure-JAX f32 reference replicating the PyTorch forward literally."""
    (w1, b1, w2, b2, w3, b3, w4, b4, w5, b5,
     wd1, bd1, wd2, bd2, wd3, bd3, wd4, bd4, wd5, bd5,
     wo, bo) = params
    n = x.shape[0]
    xf = x.reshape(n, -1)
    d1 = ebd @ wd1 + bd1
    d2 = ebd @ wd2 + bd2
    d3 = ebd @ wd3 + bd3
    d4 = ebd @ wd4 + bd4
    d5 = ebd @ wd5 + bd5

    def rep(d):
        return jnp.tile(d, (n, 1))

    h = jax.nn.relu(jnp.concatenate([xf, rep(ebd)], axis=1) @ w1 + b1)
    h = jax.nn.relu(jnp.concatenate([h, rep(d1)], axis=1) @ w2 + b2)
    h = jax.nn.relu(jnp.concatenate([h, rep(d2)], axis=1) @ w3 + b3)
    h = jax.nn.relu(jnp.concatenate([h, rep(d3)], axis=1) @ w4 + b4)
    h = jax.nn.relu(jnp.concatenate([h, rep(d4)], axis=1) @ w5 + b5)
    return jnp.concatenate([h, rep(d5)], axis=1) @ wo + bo


if __name__ == "__main__":
    key = jax.random.PRNGKey(0)
    kx, ke, kp = jax.random.split(key, 3)

    # x is NCHW with C*H*W == 512 so that flatten(1) -> (N, 512)
    x = jax.random.normal(kx, (2, 2, 16, 16), jnp.float32)
    ebd = jax.random.normal(ke, (1, 512), jnp.float32)
    params = init_params(kp)

    out = jax.block_until_ready(mlp_forward(x, ebd, params))
    ref = mlp_reference(x, ebd, params)

    assert out.shape == (2, 3), out.shape
    # bf16 MXU inputs / bf16 output tile with f32 accumulation: loosened tolerance.
    assert jnp.allclose(out, ref, atol=4e-2, rtol=4e-2), (out, ref)

    print("KERNEL_OK")
</pallas_src>

<mosaic_0001>
module attributes {stable_mosaic.version = 11 : i64} {
  func.func @_mlp_kernel(%arg0: i32, %arg1: memref<2x512xf32, #tpu.memory_space<vmem>>, %arg2: memref<512x256xbf16, #tpu.memory_space<vmem>>, %arg3: memref<1x256xf32, #tpu.memory_space<vmem>>, %arg4: memref<256x128xbf16, #tpu.memory_space<vmem>>, %arg5: memref<1x128xf32, #tpu.memory_space<vmem>>, %arg6: memref<128x128xbf16, #tpu.memory_space<vmem>>, %arg7: memref<1x128xf32, #tpu.memory_space<vmem>>, %arg8: memref<128x128xbf16, #tpu.memory_space<vmem>>, %arg9: memref<1x128xf32, #tpu.memory_space<vmem>>, %arg10: memref<128x128xbf16, #tpu.memory_space<vmem>>, %arg11: memref<1x128xf32, #tpu.memory_space<vmem>>, %arg12: memref<128x128xbf16, #tpu.memory_space<vmem>>, %arg13: memref<1x128xf32, #tpu.memory_space<vmem>>, %arg14: memref<2x128xbf16, #tpu.memory_space<vmem>>) attributes {dimension_semantics = [#tpu.dimension_semantics<parallel>], iteration_bounds = array<i64: 1>, scalar_prefetch = 0 : i64, scratch_operands = 0 : i64, tpu.core_type = #tpu.core_type<tc>, window_params = [{transform_indices = @transform_0, window_bounds = array<i64: 2, 512>}, {pipeline_mode = #tpu.pipeline_mode<synchronous>, transform_indices = @transform_1, window_bounds = array<i64: 512, 256>}, {pipeline_mode = #tpu.pipeline_mode<synchronous>, transform_indices = @transform_2, window_bounds = array<i64: 1, 256>}, {pipeline_mode = #tpu.pipeline_mode<synchronous>, transform_indices = @transform_3, window_bounds = array<i64: 256, 128>}, {pipeline_mode = #tpu.pipeline_mode<synchronous>, transform_indices = @transform_4, window_bounds = array<i64: 1, 128>}, {pipeline_mode = #tpu.pipeline_mode<synchronous>, transform_indices = @transform_5, window_bounds = array<i64: 128, 128>}, {pipeline_mode = #tpu.pipeline_mode<synchronous>, transform_indices = @transform_6, window_bounds = array<i64: 1, 128>}, {pipeline_mode = #tpu.pipeline_mode<synchronous>, transform_indices = @transform_7, window_bounds = array<i64: 128, 128>}, {pipeline_mode = #tpu.pipeline_mode<synchronous>, transform_indices = @transform_8, window_bounds = array<i64: 1, 128>}, {pipeline_mode = #tpu.pipeline_mode<synchronous>, transform_indices = @transform_9, window_bounds = array<i64: 128, 128>}, {pipeline_mode = #tpu.pipeline_mode<synchronous>, transform_indices = @transform_10, window_bounds = array<i64: 1, 128>}, {pipeline_mode = #tpu.pipeline_mode<synchronous>, transform_indices = @transform_11, window_bounds = array<i64: 128, 128>}, {pipeline_mode = #tpu.pipeline_mode<synchronous>, transform_indices = @transform_12, window_bounds = array<i64: 1, 128>}, {transform_indices = @transform_13, window_bounds = array<i64: 2, 128>}]} {
    %c0 = arith.constant 0 : index
    %c0_0 = arith.constant 0 : index
    %0 = vector.load %arg1[%c0, %c0_0] : memref<2x512xf32, #tpu.memory_space<vmem>>, vector<2x512xf32>
    %1 = arith.truncf %0 : vector<2x512xf32> to vector<2x512xbf16>
    %c0_1 = arith.constant 0 : index
    %c0_2 = arith.constant 0 : index
    %2 = vector.load %arg2[%c0_1, %c0_2] : memref<512x256xbf16, #tpu.memory_space<vmem>>, vector<512x256xbf16>
    %cst = arith.constant dense<0.000000e+00> : vector<2x256xf32>
    %3 = tpu.matmul %1, %2, %cst {dimension_numbers = #tpu.dot_dimension_numbers<[1], [0], [0], [1], [0, 0, 1, 1], [], []>} : vector<2x512xbf16>, vector<512x256xbf16>, vector<2x256xf32> -> vector<2x256xf32>
    %c0_3 = arith.constant 0 : index
    %c0_4 = arith.constant 0 : index
    %4 = vector.load %arg3[%c0_3, %c0_4] : memref<1x256xf32, #tpu.memory_space<vmem>>, vector<1x256xf32>
    %5 = vector.broadcast %4 : vector<1x256xf32> to vector<2x256xf32>
    %6 = arith.addf %3, %5 : vector<2x256xf32>
    %cst_5 = arith.constant 0.000000e+00 : f32
    %7 = vector.broadcast %cst_5 : f32 to vector<2x256xf32>
    %8 = arith.maximumf %6, %7 : vector<2x256xf32>
    %9 = arith.truncf %8 : vector<2x256xf32> to vector<2x256xbf16>
    %c0_6 = arith.constant 0 : index
    %c0_7 = arith.constant 0 : index
    %10 = vector.load %arg4[%c0_6, %c0_7] : memref<256x128xbf16, #tpu.memory_space<vmem>>, vector<256x128xbf16>
    %cst_8 = arith.constant dense<0.000000e+00> : vector<2x128xf32>
    %11 = tpu.matmul %9, %10, %cst_8 {dimension_numbers = #tpu.dot_dimension_numbers<[1], [0], [0], [1], [0, 0, 1, 1], [], []>} : vector<2x256xbf16>, vector<256x128xbf16>, vector<2x128xf32> -> vector<2x128xf32>
    %c0_9 = arith.constant 0 : index
    %c0_10 = arith.constant 0 : index
    %12 = vector.load %arg5[%c0_9, %c0_10] : memref<1x128xf32, #tpu.memory_space<vmem>>, vector<1x128xf32>
    %13 = vector.broadcast %12 : vector<1x128xf32> to vector<2x128xf32>
    %14 = arith.addf %11, %13 : vector<2x128xf32>
    %cst_11 = arith.constant 0.000000e+00 : f32
    %15 = vector.broadcast %cst_11 : f32 to vector<2x128xf32>
    %16 = arith.maximumf %14, %15 : vector<2x128xf32>
    %17 = arith.truncf %16 : vector<2x128xf32> to vector<2x128xbf16>
    %c0_12 = arith.constant 0 : index
    %c0_13 = arith.constant 0 : index
    %18 = vector.load %arg6[%c0_12, %c0_13] : memref<128x128xbf16, #tpu.memory_space<vmem>>, vector<128x128xbf16>
    %cst_14 = arith.constant dense<0.000000e+00> : vector<2x128xf32>
    %19 = tpu.matmul %17, %18, %cst_14 {dimension_numbers = #tpu.dot_dimension_numbers<[1], [0], [0], [1], [0, 0, 1, 1], [], []>} : vector<2x128xbf16>, vector<128x128xbf16>, vector<2x128xf32> -> vector<2x128xf32>
    %c0_15 = arith.constant 0 : index
    %c0_16 = arith.constant 0 : index
    %20 = vector.load %arg7[%c0_15, %c0_16] : memref<1x128xf32, #tpu.memory_space<vmem>>, vector<1x128xf32>
    %21 = vector.broadcast %20 : vector<1x128xf32> to vector<2x128xf32>
    %22 = arith.addf %19, %21 : vector<2x128xf32>
    %cst_17 = arith.constant 0.000000e+00 : f32
    %23 = vector.broadcast %cst_17 : f32 to vector<2x128xf32>
    %24 = arith.maximumf %22, %23 : vector<2x128xf32>
    %25 = arith.truncf %24 : vector<2x128xf32> to vector<2x128xbf16>
    %c0_18 = arith.constant 0 : index
    %c0_19 = arith.constant 0 : index
    %26 = vector.load %arg8[%c0_18, %c0_19] : memref<128x128xbf16, #tpu.memory_space<vmem>>, vector<128x128xbf16>
    %cst_20 = arith.constant dense<0.000000e+00> : vector<2x128xf32>
    %27 = tpu.matmul %25, %26, %cst_20 {dimension_numbers = #tpu.dot_dimension_numbers<[1], [0], [0], [1], [0, 0, 1, 1], [], []>} : vector<2x128xbf16>, vector<128x128xbf16>, vector<2x128xf32> -> vector<2x128xf32>
    %c0_21 = arith.constant 0 : index
    %c0_22 = arith.constant 0 : index
    %28 = vector.load %arg9[%c0_21, %c0_22] : memref<1x128xf32, #tpu.memory_space<vmem>>, vector<1x128xf32>
    %29 = vector.broadcast %28 : vector<1x128xf32> to vector<2x128xf32>
    %30 = arith.addf %27, %29 : vector<2x128xf32>
    %cst_23 = arith.constant 0.000000e+00 : f32
    %31 = vector.broadcast %cst_23 : f32 to vector<2x128xf32>
    %32 = arith.maximumf %30, %31 : vector<2x128xf32>
    %33 = arith.truncf %32 : vector<2x128xf32> to vector<2x128xbf16>
    %c0_24 = arith.constant 0 : index
    %c0_25 = arith.constant 0 : index
    %34 = vector.load %arg10[%c0_24, %c0_25] : memref<128x128xbf16, #tpu.memory_space<vmem>>, vector<128x128xbf16>
    %cst_26 = arith.constant dense<0.000000e+00> : vector<2x128xf32>
    %35 = tpu.matmul %33, %34, %cst_26 {dimension_numbers = #tpu.dot_dimension_numbers<[1], [0], [0], [1], [0, 0, 1, 1], [], []>} : vector<2x128xbf16>, vector<128x128xbf16>, vector<2x128xf32> -> vector<2x128xf32>
    %c0_27 = arith.constant 0 : index
    %c0_28 = arith.constant 0 : index
    %36 = vector.load %arg11[%c0_27, %c0_28] : memref<1x128xf32, #tpu.memory_space<vmem>>, vector<1x128xf32>
    %37 = vector.broadcast %36 : vector<1x128xf32> to vector<2x128xf32>
    %38 = arith.addf %35, %37 : vector<2x128xf32>
    %cst_29 = arith.constant 0.000000e+00 : f32
    %39 = vector.broadcast %cst_29 : f32 to vector<2x128xf32>
    %40 = arith.maximumf %38, %39 : vector<2x128xf32>
    %41 = arith.truncf %40 : vector<2x128xf32> to vector<2x128xbf16>
    %c0_30 = arith.constant 0 : index
    %c0_31 = arith.constant 0 : index
    %42 = vector.load %arg12[%c0_30, %c0_31] : memref<128x128xbf16, #tpu.memory_space<vmem>>, vector<128x128xbf16>
    %cst_32 = arith.constant dense<0.000000e+00> : vector<2x128xf32>
    %43 = tpu.matmul %41, %42, %cst_32 {dimension_numbers = #tpu.dot_dimension_numbers<[1], [0], [0], [1], [0, 0, 1, 1], [], []>} : vector<2x128xbf16>, vector<128x128xbf16>, vector<2x128xf32> -> vector<2x128xf32>
    %c0_33 = arith.constant 0 : index
    %c0_34 = arith.constant 0 : index
    %44 = vector.load %arg13[%c0_33, %c0_34] : memref<1x128xf32, #tpu.memory_space<vmem>>, vector<1x128xf32>
    %45 = vector.broadcast %44 : vector<1x128xf32> to vector<2x128xf32>
    %46 = arith.addf %43, %45 : vector<2x128xf32>
    %47 = arith.truncf %46 : vector<2x128xf32> to vector<2x128xbf16>
    %c0_35 = arith.constant 0 : index
    %c0_36 = arith.constant 0 : index
    %48 = vector.load %arg14[%c0_35, %c0_36] : memref<2x128xbf16, #tpu.memory_space<vmem>>, vector<2x128xbf16>
    tpu.vector_store %arg14[%c0_35, %c0_36], %47 {strides = array<i32>} : memref<2x128xbf16, #tpu.memory_space<vmem>>, vector<2x128xbf16>,
    return
  }
  func.func @transform_0(%arg0: i32) -> (i32, i32) {
    %c0_i32 = arith.constant 0 : i32
    %c0_i32_0 = arith.constant 0 : i32
    return %arg0, %c0_i32 : i32, i32
  }
  func.func @transform_1(%arg0: i32) -> (i32, i32) {
    %c0_i32 = arith.constant 0 : i32
    %c0_i32_0 = arith.constant 0 : i32
    %c0_i32_1 = arith.constant 0 : i32
    return %c0_i32, %c0_i32_0 : i32, i32
  }
  func.func @transform_2(%arg0: i32) -> (i32, i32) {
    %c0_i32 = arith.constant 0 : i32
    %c0_i32_0 = arith.constant 0 : i32
    %c0_i32_1 = arith.constant 0 : i32
    return %c0_i32, %c0_i32_0 : i32, i32
  }
  func.func @transform_3(%arg0: i32) -> (i32, i32) {
    %c0_i32 = arith.constant 0 : i32
    %c0_i32_0 = arith.constant 0 : i32
    %c0_i32_1 = arith.constant 0 : i32
    return %c0_i32, %c0_i32_0 : i32, i32
  }
  func.func @transform_4(%arg0: i32) -> (i32, i32) {
    %c0_i32 = arith.constant 0 : i32
    %c0_i32_0 = arith.constant 0 : i32
    %c0_i32_1 = arith.constant 0 : i32
    return %c0_i32, %c0_i32_0 : i32, i32
  }
  func.func @transform_5(%arg0: i32) -> (i32, i32) {
    %c0_i32 = arith.constant 0 : i32
    %c0_i32_0 = arith.constant 0 : i32
    %c0_i32_1 = arith.constant 0 : i32
    return %c0_i32, %c0_i32_0 : i32, i32
  }
  func.func @transform_6(%arg0: i32) -> (i32, i32) {
    %c0_i32 = arith.constant 0 : i32
    %c0_i32_0 = arith.constant 0 : i32
    %c0_i32_1 = arith.constant 0 : i32
    return %c0_i32, %c0_i32_0 : i32, i32
  }
  func.func @transform_7(%arg0: i32) -> (i32, i32) {
    %c0_i32 = arith.constant 0 : i32
    %c0_i32_0 = arith.constant 0 : i32
    %c0_i32_1 = arith.constant 0 : i32
    return %c0_i32, %c0_i32_0 : i32, i32
  }
  func.func @transform_8(%arg0: i32) -> (i32, i32) {
    %c0_i32 = arith.constant 0 : i32
    %c0_i32_0 = arith.constant 0 : i32
    %c0_i32_1 = arith.constant 0 : i32
    return %c0_i32, %c0_i32_0 : i32, i32
  }
  func.func @transform_9(%arg0: i32) -> (i32, i32) {
    %c0_i32 = arith.constant 0 : i32
    %c0_i32_0 = arith.constant 0 : i32
    %c0_i32_1 = arith.constant 0 : i32
    return %c0_i32, %c0_i32_0 : i32, i32
  }
  func.func @transform_10(%arg0: i32) -> (i32, i32) {
    %c0_i32 = arith.constant 0 : i32
    %c0_i32_0 = arith.constant 0 : i32
    %c0_i32_1 = arith.constant 0 : i32
    return %c0_i32, %c0_i32_0 : i32, i32
  }
  func.func @transform_11(%arg0: i32) -> (i32, i32) {
    %c0_i32 = arith.constant 0 : i32
    %c0_i32_0 = arith.constant 0 : i32
    %c0_i32_1 = arith.constant 0 : i32
    return %c0_i32, %c0_i32_0 : i32, i32
  }
  func.func @transform_12(%arg0: i32) -> (i32, i32) {
    %c0_i32 = arith.constant 0 : i32
    %c0_i32_0 = arith.constant 0 : i32
    %c0_i32_1 = arith.constant 0 : i32
    return %c0_i32, %c0_i32_0 : i32, i32
  }
  func.func @transform_13(%arg0: i32) -> (i32, i32) {
    %c0_i32 = arith.constant 0 : i32
    %c0_i32_0 = arith.constant 0 : i32
    return %arg0, %c0_i32 : i32, i32
  }
}

</mosaic_0001>

<bundles_post_ra>
// kernel: mlp_forward.1
= control target key start
LH: loop header
LB: loop body
LE: loop exit
PB: predicated region body
PF: predicated region fallthrough
CT: control target
= control target key end

     0   :  { %v1596_v7 = vmov 1983009808   ;;  %v51_v9 = vlaneseq  ;;  %vm1598_vm0 = vmmov 0   ;;  %s2086_s1 = inlined_call_operand.vmem [shape: bf16[512,256], index: 1, kind: input, shape index: {}]   ;;  %s2087_s0 = inlined_call_operand.vmem [shape: f32[2,512], index: 0, kind: input, shape index: {}]   ;;  %s2088_s3 = inlined_call_operand.vmem [shape: bf16[256,128], index: 3, kind: input, shape index: {}]   ;;  %s2089_s5 = inlined_call_operand.vmem [shape: bf16[128,128], index: 5, kind: input, shape index: {}]   ;;  %s2090_s2 = inlined_call_operand.vmem [shape: f32[1,256], index: 2, kind: input, shape index: {}]   ;;  %s2091_s7 = inlined_call_operand.vmem [shape: bf16[128,128], index: 7, kind: input, shape index: {}]   ;;  %s2092_s4 = inlined_call_operand.vmem [shape: f32[1,128], index: 4, kind: input, shape index: {}]   ;;  %s2093_s9 = inlined_call_operand.vmem [shape: bf16[128,128], index: 9, kind: input, shape index: {}]   ;;  %s2094_s6 = inlined_call_operand.vmem [shape: f32[1,128], index: 6, kind: input, shape index: {}]   ;;  %s2095_s11 = inlined_call_operand.vmem [shape: bf16[128,128], index: 11, kind: input, shape index: {}]   ;;  %s2096_s8 = inlined_call_operand.vmem [shape: f32[1,128], index: 8, kind: input, shape index: {}]   ;;  %s2097_s10 = inlined_call_operand.vmem [shape: f32[1,128], index: 10, kind: input, shape index: {}]   ;;  %s2098_s12 = inlined_call_operand.vmem [shape: f32[1,128], index: 12, kind: input, shape index: {}]   ;;  %s2099_s13 = inlined_call_operand.vmem [shape: bf16[2,128], index: 13, kind: output, shape index: {}]  }
   0x1   :  { %v1451_v0 = vld [vmem:[%s2086_s1 + $0x4] ss:$8 sps:$4 sm:$0xff]   ;;  %v1453_v1 = vld [vmem:[%s2086_s1] ss:$8 sps:$4 sm:$0xff]   ;;  %v1454_v2 = vld [vmem:[%s2086_s1 + $0x14] ss:$8 sps:$4 sm:$0xff]   ;;  %v49_v8 = vunpack.c.l.s4 %v1596_v7 }
   0x2   :  { %468 = vmatprep.subr.bf16.mxu0 %v1451_v0  ;;  %v1456_v3 = vld [vmem:[%s2086_s1 + $0x10] ss:$8 sps:$4 sm:$0xff]   ;;  %v1457_v4 = vld [vmem:[%s2086_s1 + $0x24] ss:$8 sps:$4 sm:$0xff]   ;;  %v1459_v5 = vld [vmem:[%s2086_s1 + $0x20] ss:$8 sps:$4 sm:$0xff]  }
   0x3   :  { %469 = vmatpush1.bf16.msra.mxu0 %v1453_v1  ;;  %v1460_v6 = vld [vmem:[%s2086_s1 + $0x34] ss:$8 sps:$4 sm:$0xff]   ;;  %v1462_v10 = vld [vmem:[%s2086_s1 + $0x30] ss:$8 sps:$4 sm:$0xff]   ;;  %v1463_v11 = vld [vmem:[%s2086_s1 + $0x44] ss:$8 sps:$4 sm:$0xff]   ;;  %v50_v12 = vunpack.c.0.s8 %v49_v8 }
   0x4   :  { %470 = vmatprep.subr.bf16.mxu0 %v1454_v2  ;;  %v1696_v13 = vshrl.u32 %v51_v9, 7  ;;  %v1465_v14 = vld [vmem:[%s2086_s1 + $0x40] ss:$8 sps:$4 sm:$0xff]   ;;  %v1466_v15 = vld [vmem:[%s2086_s1 + $0x54] ss:$8 sps:$4 sm:$0xff]  }
   0x5   :  { %v1468_v17 = vld [vmem:[%s2086_s1 + $0x50] ss:$8 sps:$4 sm:$0xff]   ;;  %v1469_v18 = vld [vmem:[%s2086_s1 + $0x64] ss:$8 sps:$4 sm:$0xff]   ;;  %v1471_v21 = vld [vmem:[%s2086_s1 + $0x60] ss:$8 sps:$4 sm:$0xff]  }
   0x6   :  { %v53_v16 = vsub.s32 %v50_v12, %v1696_v13  ;;  %v45_v19 = vld [vmem:[%s2087_s0] sm:$0xff]  ;;  %v1472_v22 = vld [vmem:[%s2086_s1 + $0x74] ss:$8 sps:$4 sm:$0xff]   ;;  %v1474_v25 = vld [vmem:[%s2086_s1 + $0x70] ss:$8 sps:$4 sm:$0xff]  }
   0x7   :  { %471 = vmatpush1.bf16.msra.mxu0 %v1456_v3  ;;  %v1475_v26 = vld [vmem:[%s2086_s1 + $0x84] ss:$8 sps:$4 sm:$0xff]   ;;  %v1477_v27 = vld [vmem:[%s2086_s1 + $0x80] ss:$8 sps:$4 sm:$0xff]   ;;  %v1478_v28 = vld [vmem:[%s2086_s1 + $0x94] ss:$8 sps:$4 sm:$0xff]   ;;  %v47_v44 = vcombine.high %v45_v19, %v45_v19 }
   0x8   :  { %472 = vmatprep.subr.bf16.mxu0 %v1457_v4  ;;  %v1714_v20 = vrot.slane %v45_v19, %v53_v16  ;;  %v1480_v29 = vld [vmem:[%s2086_s1 + $0x90] ss:$8 sps:$4 sm:$0xff]   ;;  %v1481_v30 = vld [vmem:[%s2086_s1 + $0xa4] ss:$8 sps:$4 sm:$0xff]   ;;  %v1483_v31 = vld [vmem:[%s2086_s1 + $0xa0] ss:$8 sps:$4 sm:$0xff]  }
   0x9   :  { %v1484_v32 = vld [vmem:[%s2086_s1 + $0xb4] ss:$8 sps:$4 sm:$0xff]   ;;  %v1486_v33 = vld [vmem:[%s2086_s1 + $0xb0] ss:$8 sps:$4 sm:$0xff]   ;;  %v1487_v34 = vld [vmem:[%s2086_s1 + $0xc4] ss:$8 sps:$4 sm:$0xff]   ;;  %v1796_v50 = vrot.slane %v47_v44, %v53_v16 }
   0xa   :  { %v62_v23 = vcombine.high %v1714_v20, %v1714_v20  ;;  %v1548_v35 = vld [vmem:[%s2088_s3 + $0x40] sm:$0xff]   ;;  %v1550_v38 = vld [vmem:[%s2088_s3 + $0x48] sm:$0xff]   ;;  %v1552_v40 = vld [vmem:[%s2088_s3 + $0x50] sm:$0xff]   ;;  %v68_v57 = vpack.c.bf16 %v1714_v20, %v1714_v20 }
   0xb   :  { %473 = vmatpush1.bf16.msra.mxu0 %v1459_v5  ;;  %v1549_v36 = vld [vmem:[%s2088_s3] sm:$0xff]   ;;  %1304 = vmatprep.subr.bf16.mxu1 %v1548_v35  ;;  %v1551_v39 = vld [vmem:[%s2088_s3 + $0x8] sm:$0xff]   ;;  %v1490_v41 = vld [vmem:[%s2086_s1 + $0xd4] ss:$8 sps:$4 sm:$0xff]   ;;  %v63_v54 = vcombine.high %v1796_v50, %v1796_v50 }
   0xc   :  { %474 = vmatprep.subr.bf16.mxu0 %v1460_v6  ;;  %v69_v24 = vpack.c.bf16 %v62_v23, %v62_v23  ;;  %v1489_v37 = vld [vmem:[%s2086_s1 + $0xc0] ss:$8 sps:$4 sm:$0xff]   ;;  %1305 = vmatpush3.bf16.msra.mxu1 %v1549_v36  ;;  %v1492_v42 = vld [vmem:[%s2086_s1 + $0xd0] ss:$8 sps:$4 sm:$0xff]   ;;  %v1493_v46 = vld [vmem:[%s2086_s1 + $0xe4] ss:$8 sps:$4 sm:$0xff]  }
   0xd   :  { %1306 = vmatprep.subr.bf16.mxu1 %v1550_v38  ;;  %v1553_v43 = vld [vmem:[%s2088_s3 + $0x10] sm:$0xff]   ;;  %v1554_v45 = vld [vmem:[%s2088_s3 + $0x58] sm:$0xff]   ;;  %v1495_v47 = vld [vmem:[%s2086_s1 + $0xe0] ss:$8 sps:$4 sm:$0xff]   ;;  %v71_v60 = vpack.c.bf16 %v63_v54, %v63_v54  ;;  %v144_v36 = vsub.s32 1, %v1696_v13 }
   0xe   :  { %500 = vmatprep.mubr.bf16.mxu0 %v69_v24  ;;  %v1496_v48 = vld [vmem:[%s2086_s1 + $0xf4] ss:$8 sps:$4 sm:$0xff]   ;;  %v1556_v51 = vld [vmem:[%s2088_s3 + $0x60] sm:$0xff]   ;;  %v1498_v53 = vld [vmem:[%s2086_s1 + $0xf0] ss:$8 sps:$4 sm:$0xff]  }
   0xf   :  { %475 = vmatpush1.bf16.msra.mxu0 %v1462_v10  ;;  %v1555_v49 = vld [vmem:[%s2088_s3 + $0x18] sm:$0xff]   ;;  %v1557_v52 = vld [vmem:[%s2088_s3 + $0x20] sm:$0xff]   ;;  %v1558_v55 = vld [vmem:[%s2088_s3 + $0x68] sm:$0xff]  }
  0x10   :  { %476 = vmatprep.subr.bf16.mxu0 %v1463_v11  ;;  %1307 = vmatpush3.bf16.msra.mxu1 %v1551_v39  ;;  %v1502_v56 = vld [vmem:[%s2086_s1 + $0x104] ss:$8 sps:$4 sm:$0xff]   ;;  %v1500_v59 = vld [vmem:[%s2086_s1 + $0x100] ss:$8 sps:$4 sm:$0xff]   ;;  %v1505_v61 = vld [vmem:[%s2086_s1 + $0x114] ss:$8 sps:$4 sm:$0xff]  }
  0x11   :  { %1308 = vmatprep.subr.bf16.mxu1 %v1552_v40  ;;  %v1559_v58 = vld [vmem:[%s2088_s3 + $0x28] sm:$0xff]   ;;  %v1503_v62 = vld [vmem:[%s2086_s1 + $0x110] ss:$8 sps:$4 sm:$0xff]   ;;  %v1511_v1 = vld [vmem:[%s2086_s1 + $0x134] ss:$8 sps:$4 sm:$0xff]  }
  0x12   :  { %v1508_v63 = vld [vmem:[%s2086_s1 + $0x124] ss:$8 sps:$4 sm:$0xff]   ;;  %v1506_v0 = vld [vmem:[%s2086_s1 + $0x120] ss:$8 sps:$4 sm:$0xff]   ;;  %v1509_v2 = vld [vmem:[%s2086_s1 + $0x130] ss:$8 sps:$4 sm:$0xff]  }
  0x13   :  { %477 = vmatpush1.bf16.msra.mxu0 %v1465_v14  ;;  %v1514_v3 = vld [vmem:[%s2086_s1 + $0x144] ss:$8 sps:$4 sm:$0xff]   ;;  %v1512_v4 = vld [vmem:[%s2086_s1 + $0x140] ss:$8 sps:$4 sm:$0xff]   ;;  %v1517_v5 = vld [vmem:[%s2086_s1 + $0x154] ss:$8 sps:$4 sm:$0xff]  }
  0x14   :  { %478 = vmatprep.subr.bf16.mxu0 %v1466_v15  ;;  %1309 = vmatpush3.bf16.msra.mxu1 %v1553_v43  ;;  %v1515_v6 = vld [vmem:[%s2086_s1 + $0x150] ss:$8 sps:$4 sm:$0xff]   ;;  %v1520_v7 = vld [vmem:[%s2086_s1 + $0x164] ss:$8 sps:$4 sm:$0xff]   ;;  %v1518_v8 = vld [vmem:[%s2086_s1 + $0x160] ss:$8 sps:$4 sm:$0xff]  }
  0x15   :  { %1310 = vmatprep.subr.bf16.mxu1 %v1554_v45  ;;  %v1523_v9 = vld [vmem:[%s2086_s1 + $0x174] ss:$8 sps:$4 sm:$0xff]   ;;  %v1521_v10 = vld [vmem:[%s2086_s1 + $0x170] ss:$8 sps:$4 sm:$0xff]   ;;  %v1526_v11 = vld [vmem:[%s2086_s1 + $0x184] ss:$8 sps:$4 sm:$0xff]  }
  0x16   :  { %v1524_v12 = vld [vmem:[%s2086_s1 + $0x180] ss:$8 sps:$4 sm:$0xff]   ;;  %v1529_v14 = vld [vmem:[%s2086_s1 + $0x194] ss:$8 sps:$4 sm:$0xff]   ;;  %v1527_v15 = vld [vmem:[%s2086_s1 + $0x190] ss:$8 sps:$4 sm:$0xff]  }
  0x17   :  { %479 = vmatpush1.bf16.msra.mxu0 %v1468_v17  ;;  %v1532_v16 = vld [vmem:[%s2086_s1 + $0x1a4] ss:$8 sps:$4 sm:$0xff]   ;;  %v1530_v17 = vld [vmem:[%s2086_s1 + $0x1a0] ss:$8 sps:$4 sm:$0xff]   ;;  %v1533_v19 = vld [vmem:[%s2086_s1 + $0x1b0] ss:$8 sps:$4 sm:$0xff]  }
  0x18   :  { %480 = vmatprep.subr.bf16.mxu0 %v1469_v18  ;;  %1311 = vmatpush3.bf16.msra.mxu1 %v1555_v49  ;;  %v1535_v18 = vld [vmem:[%s2086_s1 + $0x1b4] ss:$8 sps:$4 sm:$0xff]   ;;  %v1538_v20 = vld [vmem:[%s2086_s1 + $0x1c4] ss:$8 sps:$4 sm:$0xff]   ;;  %v1539_v23 = vld [vmem:[%s2086_s1 + $0x1d0] ss:$8 sps:$4 sm:$0xff]  }
  0x19   :  { %1312 = vmatprep.subr.bf16.mxu1 %v1556_v51  ;;  %v1544_v24 = vld [vmem:[%s2086_s1 + $0x1e4] ss:$8 sps:$4 sm:$0xff]   ;;  %v136_v35 = vld [vmem:[%s2090_s2] sm:$0x3]  ;;  %v1567_v51 = vld [vmem:[%s2089_s5 + $0x18] sm:$0xff]  }
  0x1a   :  { %v145_v38 = vrot.slane %v136_v35, %v144_v36  ;;  %v1570_v54 = vld [vmem:[%s2089_s5 + $0x30] sm:$0xff]  }
  0x1b   :  { %481 = vmatpush1.bf16.msra.mxu0 %v1471_v21  ;;  %v1536_v21 = vld [vmem:[%s2086_s1 + $0x1c0] ss:$8 sps:$4 sm:$0xff]  }
  0x1c   :  { %482 = vmatprep.subr.bf16.mxu0 %v1472_v22  ;;  %1313 = vmatpush3.bf16.msra.mxu1 %v1557_v52  ;;  %v1541_v22 = vld [vmem:[%s2086_s1 + $0x1d4] ss:$8 sps:$4 sm:$0xff]   ;;  %v1568_v52 = vld [vmem:[%s2089_s5 + $0x20] sm:$0xff]  }
  0x1d   :  { %1314 = vmatprep.subr.bf16.mxu1 %v1558_v55  ;;  %v1571_v55 = vld [vmem:[%s2089_s5 + $0x38] sm:$0xff]  }
  0x1f   :  { %483 = vmatpush1.bf16.msra.mxu0 %v1474_v25  ;;  %v1542_v25 = vld [vmem:[%s2086_s1 + $0x1e0] ss:$8 sps:$4 sm:$0xff]  }
  0x20   :  { %484 = vmatprep.subr.bf16.mxu0 %v1475_v26  ;;  %1315 = vmatpush3.bf16.msra.mxu1 %v1559_v58  ;;  %v1547_v26 = vld [vmem:[%s2086_s1 + $0x1f4] ss:$8 sps:$4 sm:$0xff]  }
  0x23   :  { %485 = vmatpush1.bf16.msra.mxu0 %v1477_v27  ;;  %v1545_v27 = vld [vmem:[%s2086_s1 + $0x1f0] ss:$8 sps:$4 sm:$0xff]  }
  0x24   :  { %486 = vmatprep.subr.bf16.mxu0 %v1478_v28  ;;  %v70_v28 = vpack.c.bf16 %v1796_v50, %v1796_v50  ;;  %v1566_v50 = vld [vmem:[%s2089_s5 + $0x10] sm:$0xff]  }
  0x27   :  { %487 = vmatpush1.bf16.msra.mxu0 %v1480_v29  ;;  %v1560_v29 = vld [vmem:[%s2088_s3 + $0x70] sm:$0xff]  }
  0x28   :  { %488 = vmatprep.subr.bf16.mxu0 %v1481_v30  ;;  %v1561_v30 = vld [vmem:[%s2088_s3 + $0x30] sm:$0xff]   ;;  %1316 = vmatprep.subr.bf16.mxu1 %v1560_v29  ;;  %v1591_v29 = vld [vmem:[%s2095_s11 + $0x18] sm:$0xff]  }
  0x29   :  { %1317 = vmatpush3.bf16.msra.mxu1 %v1561_v30  ;;  %v1592_v30 = vld [vmem:[%s2095_s11 + $0x20] sm:$0xff]  }
  0x2b   :  { %489 = vmatpush1.bf16.msra.mxu0 %v1483_v31  ;;  %v1562_v31 = vld [vmem:[%s2088_s3 + $0x78] sm:$0xff]  }
  0x2c   :  { %490 = vmatprep.subr.bf16.mxu0 %v1484_v32  ;;  %v1563_v32 = vld [vmem:[%s2088_s3 + $0x38] sm:$0xff]   ;;  %1318 = vmatprep.subr.bf16.mxu1 %v1562_v31  ;;  %v1593_v31 = vld [vmem:[%s2095_s11 + $0x28] sm:$0xff]  }
  0x2d   :  { %1319 = vmatpush3.bf16.msra.mxu1 %v1563_v32  ;;  %v1277_v32 = vld [vmem:[%s2096_s8] ss:$0 sm:$0xff] }
  0x2f   :  { %491 = vmatpush1.bf16.msra.mxu0 %v1486_v33  ;;  %v1597_v33 = vmov 0.0  }
  0x30   :  { %492 = vmatprep.subr.bf16.mxu0 %v1487_v34  ;;  %1362 = vmatprep.subr.bf16.mxu1 %v1597_v33  ;;  %v140_v34 = vsub.s32 0, %v1696_v13  ;;  %v1565_v13 = vld [vmem:[%s2089_s5 + $0x8] sm:$0xff]  }
  0x33   :  { %493 = vmatpush1.bf16.msra.mxu0 %v1489_v37  ;;  %v141_v37 = vrot.slane %v136_v35, %v140_v34 }
  0x34   :  { %494 = vmatprep.subr.bf16.mxu0 %v1490_v41 }
  0x37   :  { %495 = vmatpush1.bf16.msra.mxu0 %v1492_v42 }
  0x38   :  { %496 = vmatprep.subr.bf16.mxu0 %v1493_v46 }
  0x3b   :  { %497 = vmatpush1.bf16.msra.mxu0 %v1495_v47 }
  0x3c   :  { %498 = vmatprep.subr.bf16.mxu0 %v1496_v48  ;;  %v1564_v48 = vld [vmem:[%s2089_s5] sm:$0xff]  }
  0x3f   :  { %499 = vmatpush1.bf16.msra.mxu0 %v1498_v53  ;;  %v1569_v53 = vld [vmem:[%s2089_s5 + $0x28] sm:$0xff]  }
  0x40   :  { %509 = vmatprep.subr.bf16.mxu0 %v1502_v56 }
  0x42   :  { %501 = vmatmul.mubr.bf16.vlgmr.msra.gmra.mrb[0].mxu0 %v68_v57  ;;  %v1251_v57 = vld [vmem:[%s2092_s4] ss:$0 sm:$0xff] }
  0x43   :  { %510 = vmatpush1.bf16.msra.mxu0 %v1500_v59  ;;  %541 = vmatprep.mubr.bf16.mxu0 %v71_v60 }
  0x44   :  { %511 = vmatprep.subr.bf16.mxu0 %v1505_v61 }
  0x47   :  { %512 = vmatpush1.bf16.msra.mxu0 %v1503_v62 }
  0x48   :  { %513 = vmatprep.subr.bf16.mxu0 %v1508_v63 }
  0x4b   :  { %514 = vmatpush1.bf16.msra.mxu0 %v1506_v0  ;;  %v1572_v0 = vld [vmem:[%s2091_s7] sm:$0xff]  }
  0x4c   :  { %515 = vmatprep.subr.bf16.mxu0 %v1511_v1 }
  0x4f   :  { %516 = vmatpush1.bf16.msra.mxu0 %v1509_v2  ;;  %v1573_v2 = vld [vmem:[%s2091_s7 + $0x8] sm:$0xff]  }
  0x50   :  { %517 = vmatprep.subr.bf16.mxu0 %v1514_v3  ;;  %v1574_v3 = vld [vmem:[%s2091_s7 + $0x10] sm:$0xff]  }
  0x53   :  { %518 = vmatpush1.bf16.msra.mxu0 %v1512_v4  ;;  %v1575_v4 = vld [vmem:[%s2091_s7 + $0x18] sm:$0xff]  }
  0x54   :  { %519 = vmatprep.subr.bf16.mxu0 %v1517_v5  ;;  %v1576_v5 = vld [vmem:[%s2091_s7 + $0x20] sm:$0xff]  }
  0x57   :  { %520 = vmatpush1.bf16.msra.mxu0 %v1515_v6  ;;  %v1577_v6 = vld [vmem:[%s2091_s7 + $0x28] sm:$0xff]  }
  0x58   :  { %521 = vmatprep.subr.bf16.mxu0 %v1520_v7  ;;  %v1578_v7 = vld [vmem:[%s2091_s7 + $0x30] sm:$0xff]  }
  0x5b   :  { %522 = vmatpush1.bf16.msra.mxu0 %v1518_v8  ;;  %v1579_v8 = vld [vmem:[%s2091_s7 + $0x38] sm:$0xff]  }
  0x5c   :  { %523 = vmatprep.subr.bf16.mxu0 %v1523_v9  ;;  %v1268_v9 = vld [vmem:[%s2094_s6] ss:$0 sm:$0xff] }
  0x5f   :  { %524 = vmatpush1.bf16.msra.mxu0 %v1521_v10 }
  0x60   :  { %525 = vmatprep.subr.bf16.mxu0 %v1526_v11 }
  0x63   :  { %526 = vmatpush1.bf16.msra.mxu0 %v1524_v12 }
  0x64   :  { %527 = vmatprep.subr.bf16.mxu0 %v1529_v14 }
  0x67   :  { %528 = vmatpush1.bf16.msra.mxu0 %v1527_v15 }
  0x68   :  { %529 = vmatprep.subr.bf16.mxu0 %v1532_v16 }
  0x6b   :  { %530 = vmatpush1.bf16.msra.mxu0 %v1530_v17  ;;  %v1580_v17 = vld [vmem:[%s2093_s9] sm:$0xff]  }
  0x6c   :  { %531 = vmatprep.subr.bf16.mxu0 %v1535_v18 }
  0x6f   :  { %532 = vmatpush1.bf16.msra.mxu0 %v1533_v19  ;;  %v1581_v19 = vld [vmem:[%s2093_s9 + $0x8] sm:$0xff]  }
  0x70   :  { %533 = vmatprep.subr.bf16.mxu0 %v1538_v20  ;;  %v1582_v20 = vld [vmem:[%s2093_s9 + $0x10] sm:$0xff]  }
  0x73   :  { %534 = vmatpush1.bf16.msra.mxu0 %v1536_v21  ;;  %v1583_v21 = vld [vmem:[%s2093_s9 + $0x18] sm:$0xff]  }
  0x74   :  { %535 = vmatprep.subr.bf16.mxu0 %v1541_v22  ;;  %v1584_v22 = vld [vmem:[%s2093_s9 + $0x20] sm:$0xff]  }
  0x77   :  { %536 = vmatpush1.bf16.msra.mxu0 %v1539_v23  ;;  %v1585_v23 = vld [vmem:[%s2093_s9 + $0x28] sm:$0xff]  }
  0x78   :  { %537 = vmatprep.subr.bf16.mxu0 %v1544_v24  ;;  %v1586_v24 = vld [vmem:[%s2093_s9 + $0x30] sm:$0xff]  }
  0x7b   :  { %538 = vmatpush1.bf16.msra.mxu0 %v1542_v25  ;;  %v1587_v25 = vld [vmem:[%s2093_s9 + $0x38] sm:$0xff]  }
  0x7c   :  { %539 = vmatprep.subr.bf16.mxu0 %v1547_v26  ;;  %v1588_v26 = vld [vmem:[%s2095_s11] sm:$0xff]  }
  0x7f   :  { %540 = vmatpush1.bf16.msra.mxu0 %v1545_v27  ;;  %v1589_v27 = vld [vmem:[%s2095_s11 + $0x8] sm:$0xff]  }
  0x80   :  { %1422 = vmatprep.subr.bf16.mxu0 %v1597_v33 }
  0x82   :  { %542 = vmatmul.mubr.bf16.vlgmr.msra.gmra.mrb[0].mxu0 %v70_v28  ;;  %v1590_v28 = vld [vmem:[%s2095_s11 + $0x10] sm:$0xff]  }
  0x83   :  { %1438 = vmatprep.mubr.msk.bf16.mxu0 %vm1598_vm0, %v1597_v33  ;;  %1423 = vmatpush3.bf16.msra.mxu0 %v1588_v26 }
  0x84   :  { %1424 = vmatprep.subr.bf16.mxu0 %v1597_v33 }
  0x87   :  { %1425 = vmatpush3.bf16.msra.mxu0 %v1589_v27 }
  0x88   :  { %1426 = vmatprep.subr.bf16.mxu0 %v1597_v33 }
  0x8b   :  { %1427 = vmatpush3.bf16.msra.mxu0 %v1590_v28 }
  0x8c   :  { %1428 = vmatprep.subr.bf16.mxu0 %v1597_v33 }
  0x8f   :  { %1429 = vmatpush3.bf16.msra.mxu0 %v1591_v29 }
  0x90   :  { %1430 = vmatprep.subr.bf16.mxu0 %v1597_v33 }
  0x93   :  { %1431 = vmatpush3.bf16.msra.mxu0 %v1592_v30 }
  0x94   :  { %1432 = vmatprep.subr.bf16.mxu0 %v1597_v33 }
  0x97   :  { %1433 = vmatpush3.bf16.msra.mxu0 %v1593_v31 }
  0x98   :  { %1434 = vmatprep.subr.bf16.mxu0 %v1597_v33 }
 0x155   :  { %v543_v39 = vpop.f32.mrb[0].mxu0 }
 0x156   :  { %v1442_v40 = vadd.f32 %v543_v39, %v141_v37  ;;  %v545_v41 = vpop.f32.mrb[1].mxu0 }
 0x157   :  { %v1443_v42 = vadd.f32 %v545_v41, %v145_v38  ;;  %v547_v43 = vpop.f32.mrb[2].mxu0  ;;  %v1594_v41 = vld [vmem:[%s2095_s11 + $0x30] sm:$0xff]  }
 0x158   :  { %v550_v44 = vmax.f32 %v1442_v40, 0.0  ;;  %v548_v45 = vpop.f32.mrb[3].mxu0  ;;  %1435 = vmatpush3.bf16.msra.mxu0 %v1594_v41  ;;  %v1286_v43 = vld [vmem:[%s2097_s10] ss:$0 sm:$0xff] }
 0x159   :  { %v551_v46 = vmax.f32 %v1443_v42, 0.0  ;;  %1436 = vmatprep.subr.bf16.mxu0 %v1597_v33  ;;  %v1595_v42 = vld [vmem:[%s2095_s11 + $0x38] sm:$0xff]  }
 0x15a   :  { %v552_v49 = vpack.c.bf16 %v550_v44, %v550_v44 }
 0x15b   :  { %v553_v47 = vpack.c.bf16 %v551_v46, %v551_v46 }
 0x15c   :  { %1437 = vmatpush3.bf16.msra.mxu0 %v1595_v42 }
 0x15d   :  { %721 = vmatprep.mubr.bf16.mxu1 %v553_v47 }
 0x15e   :  { %722 = vmatmul.mubr.bf16.vlgmr.msra.gmra.mrb[0].mxu1 %v552_v49 }
 0x15f   :  { %1363 = vmatpush3.bf16.msra.mxu1 %v1564_v48  ;;  %1378 = vmatprep.mubr.msk.bf16.mxu1 %vm1598_vm0, %v1597_v33 }
 0x160   :  { %1364 = vmatprep.subr.bf16.mxu1 %v1597_v33 }
 0x163   :  { %1365 = vmatpush3.bf16.msra.mxu1 %v1565_v13 }
 0x164   :  { %1366 = vmatprep.subr.bf16.mxu1 %v1597_v33 }
 0x167   :  { %1367 = vmatpush3.bf16.msra.mxu1 %v1566_v50 }
 0x168   :  { %1368 = vmatprep.subr.bf16.mxu1 %v1597_v33 }
 0x16b   :  { %1369 = vmatpush3.bf16.msra.mxu1 %v1567_v51 }
 0x16c   :  { %1370 = vmatprep.subr.bf16.mxu1 %v1597_v33 }
 0x16f   :  { %1371 = vmatpush3.bf16.msra.mxu1 %v1568_v52 }
 0x170   :  { %1372 = vmatprep.subr.bf16.mxu1 %v1597_v33 }
 0x173   :  { %1373 = vmatpush3.bf16.msra.mxu1 %v1569_v53 }
 0x174   :  { %1374 = vmatprep.subr.bf16.mxu1 %v1597_v33 }
 0x177   :  { %1375 = vmatpush3.bf16.msra.mxu1 %v1570_v54 }
 0x178   :  { %1376 = vmatprep.subr.bf16.mxu1 %v1597_v33 }
 0x17b   :  { %1377 = vmatpush3.bf16.msra.mxu1 %v1571_v55 }
 0x17c   :  { %1382 = vmatprep.subr.bf16.mxu1 %v1597_v33 }
 0x231   :  { %v1320_v56 = vpop.f32.mrb[0].mxu1 }
 0x232   :  { %v1321_v58 = vpop.f32.mrb[1].mxu1 }
 0x233   :  { %v1322_v59 = vadd.f32 %v1321_v58, %v1320_v56  ;;  %v1323_v60 = vpop.f32.mrb[2].mxu1 }
 0x234   :  { %v1324_v61 = vpop.f32.mrb[3].mxu1 }
 0x235   :  { %v724_v62 = vadd.f32 %v1322_v59, %v1251_v57 }
 0x237   :  { %v729_v63 = vmax.f32 %v724_v62, 0.0 }
 0x239   :  { %v730_v1 = vpack.c.bf16 %v729_v63, %v729_v63 }
 0x23b   :  { %1379 = vmatmul.mubr.bf16.vlgmr.msra.gmra.mrb[4].mxu1 %v730_v1 }
 0x23c   :  { %1383 = vmatpush3.bf16.msra.mxu1 %v1572_v0  ;;  %1398 = vmatprep.mubr.msk.bf16.mxu1 %vm1598_vm0, %v1597_v33 }
 0x23d   :  { %1384 = vmatprep.subr.bf16.mxu1 %v1597_v33 }
 0x240   :  { %1385 = vmatpush3.bf16.msra.mxu1 %v1573_v2 }
 0x241   :  { %1386 = vmatprep.subr.bf16.mxu1 %v1597_v33 }
 0x244   :  { %1387 = vmatpush3.bf16.msra.mxu1 %v1574_v3 }
 0x245   :  { %1388 = vmatprep.subr.bf16.mxu1 %v1597_v33 }
 0x248   :  { %1389 = vmatpush3.bf16.msra.mxu1 %v1575_v4 }
 0x249   :  { %1390 = vmatprep.subr.bf16.mxu1 %v1597_v33 }
 0x24c   :  { %1391 = vmatpush3.bf16.msra.mxu1 %v1576_v5 }
 0x24d   :  { %1392 = vmatprep.subr.bf16.mxu1 %v1597_v33 }
 0x250   :  { %1393 = vmatpush3.bf16.msra.mxu1 %v1577_v6 }
 0x251   :  { %1394 = vmatprep.subr.bf16.mxu1 %v1597_v33 }
 0x254   :  { %1395 = vmatpush3.bf16.msra.mxu1 %v1578_v7 }
 0x255   :  { %1396 = vmatprep.subr.bf16.mxu1 %v1597_v33 }
 0x258   :  { %1397 = vmatpush3.bf16.msra.mxu1 %v1579_v8 }
 0x259   :  { %1402 = vmatprep.subr.bf16.mxu1 %v1597_v33 }
 0x30e   :  { %v836_v10 = vpop.f32.mrb[4].mxu1 }
 0x30f   :  { %v837_v11 = vadd.f32 %v1268_v9, %v836_v10  ;;  %v1380_v12 = vpop.f32.mrb[5].mxu1 }
 0x310   :  { %v839_v14 = vpop.f32.mrb[6].mxu1 }
 0x311   :  { %v842_v15 = vmax.f32 %v837_v11, 0.0  ;;  %v1381_v16 = vpop.f32.mrb[7].mxu1 }
 0x313   :  { %v843_v18 = vpack.c.bf16 %v842_v15, %v842_v15 }
 0x315   :  { %1399 = vmatmul.mubr.bf16.vlgmr.msra.gmra.mrb[8].mxu1 %v843_v18 }
 0x316   :  { %1403 = vmatpush3.bf16.msra.mxu1 %v1580_v17  ;;  %1418 = vmatprep.mubr.msk.bf16.mxu1 %vm1598_vm0, %v1597_v33 }
 0x317   :  { %1404 = vmatprep.subr.bf16.mxu1 %v1597_v33 }
 0x31a   :  { %1405 = vmatpush3.bf16.msra.mxu1 %v1581_v19 }
 0x31b   :  { %1406 = vmatprep.subr.bf16.mxu1 %v1597_v33 }
 0x31e   :  { %1407 = vmatpush3.bf16.msra.mxu1 %v1582_v20 }
 0x31f   :  { %1408 = vmatprep.subr.bf16.mxu1 %v1597_v33 }
 0x322   :  { %1409 = vmatpush3.bf16.msra.mxu1 %v1583_v21 }
 0x323   :  { %1410 = vmatprep.subr.bf16.mxu1 %v1597_v33 }
 0x326   :  { %1411 = vmatpush3.bf16.msra.mxu1 %v1584_v22 }
 0x327   :  { %1412 = vmatprep.subr.bf16.mxu1 %v1597_v33 }
 0x32a   :  { %1413 = vmatpush3.bf16.msra.mxu1 %v1585_v23 }
 0x32b   :  { %1414 = vmatprep.subr.bf16.mxu1 %v1597_v33 }
 0x32e   :  { %1415 = vmatpush3.bf16.msra.mxu1 %v1586_v24 }
 0x32f   :  { %1416 = vmatprep.subr.bf16.mxu1 %v1597_v33  ;;  %v1295_v33 = vld [vmem:[%s2098_s12] ss:$0 sm:$0xff] }
 0x332   :  { %1417 = vmatpush3.bf16.msra.mxu1 %v1587_v25 }
 0x3e8   :  { %v949_v34 = vpop.f32.mrb[8].mxu1 }
 0x3e9   :  { %v950_v35 = vadd.f32 %v1277_v32, %v949_v34  ;;  %v1400_v36 = vpop.f32.mrb[9].mxu1 }
 0x3ea   :  { %v952_v37 = vpop.f32.mrb[10].mxu1 }
 0x3eb   :  { %v955_v38 = vmax.f32 %v950_v35, 0.0  ;;  %v1401_v39 = vpop.f32.mrb[11].mxu1 }
 0x3ed   :  { %v956_v40 = vpack.c.bf16 %v955_v38, %v955_v38 }
 0x3ef   :  { %1419 = vmatmul.mubr.bf16.vlgmr.msra.gmra.mrb[12].mxu1 %v956_v40 }
 0x4c2   :  { %v1062_v44 = vpop.f32.mrb[12].mxu1 }
 0x4c3   :  { %v1063_v45 = vadd.f32 %v1286_v43, %v1062_v44  ;;  %v1420_v46 = vpop.f32.mrb[13].mxu1 }
 0x4c4   :  { %v1065_v47 = vpop.f32.mrb[14].mxu1 }
 0x4c5   :  { %v1068_v48 = vmax.f32 %v1063_v45, 0.0  ;;  %v1421_v49 = vpop.f32.mrb[15].mxu1 }
 0x4c7   :  { %v1069_v13 = vpack.c.bf16 %v1068_v48, %v1068_v48 }
 0x4c9   :  { %1439 = vmatmul.mubr.bf16.vlgmr.msra.gmra.mrb[4].mxu0 %v1069_v13 }
 0x59c   :  { %v1175_v50 = vpop.f32.mrb[4].mxu0 }
 0x59d   :  { %v1176_v51 = vadd.f32 %v1295_v33, %v1175_v50  ;;  %v1440_v52 = vpop.f32.mrb[5].mxu0 }
 0x59e   :  { %v1178_v53 = vpop.f32.mrb[6].mxu0 }
 0x59f   :  { %v1181_v54 = vpack.c.bf16 %v1176_v51, %v1176_v51  ;;  %v1441_v55 = vpop.f32.mrb[7].mxu0 }
 0x5a1   :  { %1182 = vst [vmem:[%s2099_s13] sm:$0x1] %v1181_v54 }

</bundles_post_ra>
